<compile_context>
chip_gen: v6e
topology: v6e:2x2x1
jax: 0.10.0
libtpu: 0.0.40
codegen_flags: <defaults>
</compile_context>

<pallas_src>
import functools

import jax
import jax.numpy as jnp
from jax.experimental import pallas as pl
from jax.experimental.pallas import tpu as pltpu


def _readout_mlp_kernel(x_ref, w1_ref, b1_ref, w2_ref, b2_ref, o_ref, *, mxu_dtype):
    # x_ref : [TR, G*C] tile -- each row holds G atoms x C channels (lane-dense)
    # w1_ref: [G*C, G*C]  kron(I_G, W1.T), block-diagonal        (mxu_dtype)
    # b1_ref: [1, G*C]    b1 tiled G times                        (f32)
    # w2_ref: [G*C, G]    kron(I_G, W2.T)                         (mxu_dtype)
    # b2_ref: [1, G]      b2 tiled G times                        (f32)
    # o_ref : [TR, G]     one scalar per atom
    x = x_ref[...].astype(mxu_dtype)          # cast in-kernel: no extra HBM pass
    h = jnp.dot(x, w1_ref[...], preferred_element_type=jnp.float32)
    h = h + b1_ref[...]

    # SiLU in f32 (EUP sigmoid + VPU mul); v5e has no bf16 VPU/EUP.
    # TODO(synk): if a v7x bundle dump shows the EUP slot binding, compute the
    #             sigmoid in bf16 there and keep the multiply in f32.
    h = h * jax.nn.sigmoid(h)

    # layer2: cast h back to mxu_dtype so the (128-col padded) second matmul
    # stays cheap on v5e's bf16-only MXU; accumulation stays f32.
    o = jnp.dot(h.astype(mxu_dtype), w2_ref[...],
                preferred_element_type=jnp.float32) + b2_ref[...]
    o_ref[...] = o.astype(o_ref.dtype)


def readout_mlp(x, w1, b1, w2, b2, *, tile_n=16384, mxu_dtype=jnp.bfloat16):
    """ReadoutMLP forward (way == 0).

    x : [N, C]   atoms x channels (f32, or bf16 consumed as-is)
    w1: [C, C], b1: [C]   layer1 (nn.Linear convention: y = x @ W1.T + b1)
    w2: [1, C], b2: [1]   layer2
    tile_n   : atoms per grid step (sweep 8192-32768; 16384 fits all gens)
    mxu_dtype: jnp.bfloat16 (fast, default) or jnp.float32 (exact path)
    returns [N, 1] in x.dtype.
    """
    N, C = x.shape
    out_dtype = x.dtype

    # --- group g atoms per row so the streamed block's last dim is 128 lanes.
    g = 128 // C if (C < 128 and 128 % C == 0) else 1
    Ng = pl.cdiv(N, g) * g
    if Ng != N:
        # TODO(synk): this pads (copies) x; supply the atom count as a multiple
        #             of 128 // n_dim upstream to keep this path copy-free.
        x = jnp.pad(x, ((0, Ng - N), (0, 0)))
    rows = Ng // g
    xg = x.reshape(rows, g * C)          # contiguous reshape: free under jit

    # --- block-diagonal weights: one canonical matmul per layer, no transposes.
    eye_g = jnp.eye(g, dtype=jnp.float32)
    w1_bd = jnp.kron(eye_g, w1.T.astype(jnp.float32)).astype(mxu_dtype)   # [gC, gC]
    w2_bd = jnp.kron(eye_g, w2.T.astype(jnp.float32)).astype(mxu_dtype)   # [gC, g]
    b1_bd = jnp.tile(b1.astype(jnp.float32), g).reshape(1, g * C)
    b2_bd = jnp.tile(b2.astype(jnp.float32), g).reshape(1, g)

    # --- tiling: rows forced to a sublane multiple (fixes arbitrary tile_n),
    #     ragged last block handled by Pallas (no pad of x up to a tile
    #     multiple), and >= 2 grid steps when possible for v7x megacore.
    sub = max(8, 32 // jnp.dtype(x.dtype).itemsize)        # 8 for f32, 16 for bf16
    tile_rows = max(sub, (max(tile_n, g) // g // sub) * sub)
    tile_rows = min(tile_rows, pl.cdiv(rows, sub) * sub)
    if tile_rows >= rows and rows >= 2 * sub:
        tile_rows = pl.cdiv(pl.cdiv(rows, 2), sub) * sub   # split for megacore
    grid = (pl.cdiv(rows, tile_rows),)

    itemsize = jnp.dtype(x.dtype).itemsize
    cost = pl.CostEstimate(
        flops=2 * N * C * C + 2 * N * C,
        transcendentals=N * C,
        bytes_accessed=(N * C * itemsize
                        + N * jnp.dtype(out_dtype).itemsize
                        + (g * C) * (g * C + g) * jnp.dtype(mxu_dtype).itemsize),
    )

    out = pl.pallas_call(
        functools.partial(_readout_mlp_kernel, mxu_dtype=mxu_dtype),
        out_shape=jax.ShapeDtypeStruct((rows, g), out_dtype),
        grid_spec=pltpu.PrefetchScalarGridSpec(
            num_scalar_prefetch=0,
            grid=grid,
            in_specs=[
                pl.BlockSpec((tile_rows, g * C), lambda i: (i, 0)),   # x (streamed)
                pl.BlockSpec((g * C, g * C), lambda i: (0, 0)),       # W1 (resident)
                pl.BlockSpec((1, g * C), lambda i: (0, 0)),           # b1
                pl.BlockSpec((g * C, g), lambda i: (0, 0)),           # W2
                pl.BlockSpec((1, g), lambda i: (0, 0)),               # b2
            ],
            out_specs=pl.BlockSpec((tile_rows, g), lambda i: (i, 0)),
        ),
        compiler_params=pltpu.CompilerParams(
            dimension_semantics=("parallel",),
            vmem_limit_bytes=32 * 1024 * 1024,  # >= default on all gens; headroom on v5e
        ),
        cost_estimate=cost,
    )(xg, w1_bd, b1_bd, w2_bd, b2_bd)

    # [rows, g] -> [Ng, 1] -> [N, 1]  (contiguous reshape; free under jit)
    return out.reshape(Ng, 1)[:N]


def readout_mlp_ref(x, w1, b1, w2, b2):
    h = x @ w1.T + b1
    h = h * jax.nn.sigmoid(h)
    return h @ w2.T + b2


if __name__ == "__main__":
    n_atoms = 200    # atoms (multiple of 128 // n_dim -> copy-free grouping path)
    n_dim = 32       # channel width of ReadoutMLP(n_dim, way=0)

    key = jax.random.PRNGKey(0)
    kx, k1, k2, k3 = jax.random.split(key, 4)

    x = jax.random.normal(kx, (n_atoms, n_dim), dtype=jnp.float32)

    # Deterministic synthetic parameters (nn.Linear-like scales).
    w1 = jax.random.normal(k1, (n_dim, n_dim), dtype=jnp.float32) / jnp.sqrt(n_dim)
    b1 = jax.random.normal(k2, (n_dim,), dtype=jnp.float32) * 0.1
    w2 = jax.random.normal(k3, (1, n_dim), dtype=jnp.float32) / jnp.sqrt(n_dim)
    b2 = jnp.array([0.05], dtype=jnp.float32)

    ref = readout_mlp_ref(x, w1, b1, w2, b2)

    # Exact-precision path (f32 MXU inputs): must match the reference tightly.
    out_f32 = jax.block_until_ready(readout_mlp(x, w1, b1, w2, b2, mxu_dtype=jnp.float32))
    assert out_f32.shape == (n_atoms, 1)
    assert jnp.allclose(out_f32, ref, atol=1e-5, rtol=1e-5), "f32 mismatch vs reference"

    # Default performance path (bf16 MXU inputs, f32 accumulation + f32 SiLU).
    out_bf16 = jax.block_until_ready(readout_mlp(x, w1, b1, w2, b2))
    assert out_bf16.shape == (n_atoms, 1)
    assert jnp.allclose(out_bf16, ref, atol=5e-2, rtol=5e-2), "bf16 mismatch vs reference"

    # Small explicit tile: exercises the multi-step streamed grid path.
    out_small = jax.block_until_ready(
        readout_mlp(x, w1, b1, w2, b2, tile_n=64, mxu_dtype=jnp.float32))
    assert jnp.allclose(out_small, ref, atol=1e-5, rtol=1e-5), "tiled mismatch"

    # Atom count not a multiple of 128 // n_dim: exercises the padded fallback
    # and the ragged final block.
    x_odd = jax.random.normal(kx, (203, n_dim), dtype=jnp.float32)
    ref_odd = readout_mlp_ref(x_odd, w1, b1, w2, b2)
    out_odd = jax.block_until_ready(
        readout_mlp(x_odd, w1, b1, w2, b2, mxu_dtype=jnp.float32))
    assert out_odd.shape == (203, 1)
    assert jnp.allclose(out_odd, ref_odd, atol=1e-5, rtol=1e-5), "odd-N mismatch"

    print("KERNEL_OK")
</pallas_src>

<mosaic_0001>
module attributes {stable_mosaic.version = 11 : i64} {
  func.func @_readout_mlp_kernel(%arg0: i32, %arg1: memref<32x128xf32, #tpu.memory_space<vmem>>, %arg2: memref<128x128xf32, #tpu.memory_space<vmem>>, %arg3: memref<1x128xf32, #tpu.memory_space<vmem>>, %arg4: memref<128x4xf32, #tpu.memory_space<vmem>>, %arg5: memref<1x4xf32, #tpu.memory_space<vmem>>, %arg6: memref<32x4xf32, #tpu.memory_space<vmem>>) attributes {dimension_semantics = [#tpu.dimension_semantics<parallel>], iteration_bounds = array<i64: 2>, scalar_prefetch = 0 : i64, scratch_operands = 0 : i64, tpu.core_type = #tpu.core_type<tc>, window_params = [{transform_indices = @transform_0, window_bounds = array<i64: 32, 128>}, {pipeline_mode = #tpu.pipeline_mode<synchronous>, transform_indices = @transform_1, window_bounds = array<i64: 128, 128>}, {pipeline_mode = #tpu.pipeline_mode<synchronous>, transform_indices = @transform_2, window_bounds = array<i64: 1, 128>}, {pipeline_mode = #tpu.pipeline_mode<synchronous>, transform_indices = @transform_3, window_bounds = array<i64: 128, 4>}, {pipeline_mode = #tpu.pipeline_mode<synchronous>, transform_indices = @transform_4, window_bounds = array<i64: 1, 4>}, {transform_indices = @transform_5, window_bounds = array<i64: 32, 4>}]} {
    %c0 = arith.constant 0 : index
    %c0_0 = arith.constant 0 : index
    %0 = vector.load %arg1[%c0, %c0_0] : memref<32x128xf32, #tpu.memory_space<vmem>>, vector<32x128xf32>
    %c0_1 = arith.constant 0 : index
    %c0_2 = arith.constant 0 : index
    %1 = vector.load %arg2[%c0_1, %c0_2] : memref<128x128xf32, #tpu.memory_space<vmem>>, vector<128x128xf32>
    %cst = arith.constant dense<0.000000e+00> : vector<32x128xf32>
    %2 = tpu.matmul %0, %1, %cst {dimension_numbers = #tpu.dot_dimension_numbers<[1], [0], [0], [1], [0, 0, 1, 1], [], []>} : vector<32x128xf32>, vector<128x128xf32>, vector<32x128xf32> -> vector<32x128xf32>
    %c0_3 = arith.constant 0 : index
    %c0_4 = arith.constant 0 : index
    %3 = vector.load %arg3[%c0_3, %c0_4] : memref<1x128xf32, #tpu.memory_space<vmem>>, vector<1x128xf32>
    %4 = vector.broadcast %3 : vector<1x128xf32> to vector<32x128xf32>
    %5 = arith.addf %2, %4 : vector<32x128xf32>
    %6 = arith.negf %5 : vector<32x128xf32>
    %7 = math.exp %6 : vector<32x128xf32>
    %cst_5 = arith.constant 1.000000e+00 : f32
    %8 = vector.broadcast %cst_5 : f32 to vector<32x128xf32>
    %9 = arith.addf %8, %7 : vector<32x128xf32>
    %10 = arith.divf %8, %9 : vector<32x128xf32>
    %11 = arith.mulf %5, %10 : vector<32x128xf32>
    %c0_6 = arith.constant 0 : index
    %c0_7 = arith.constant 0 : index
    %12 = vector.load %arg4[%c0_6, %c0_7] : memref<128x4xf32, #tpu.memory_space<vmem>>, vector<128x4xf32>
    %cst_8 = arith.constant dense<0.000000e+00> : vector<32x4xf32>
    %13 = tpu.matmul %11, %12, %cst_8 {dimension_numbers = #tpu.dot_dimension_numbers<[1], [0], [0], [1], [0, 0, 1, 1], [], []>} : vector<32x128xf32>, vector<128x4xf32>, vector<32x4xf32> -> vector<32x4xf32>
    %c0_9 = arith.constant 0 : index
    %c0_10 = arith.constant 0 : index
    %14 = vector.load %arg5[%c0_9, %c0_10] : memref<1x4xf32, #tpu.memory_space<vmem>>, vector<1x4xf32>
    %15 = vector.broadcast %14 : vector<1x4xf32> to vector<32x4xf32>
    %16 = arith.addf %13, %15 : vector<32x4xf32>
    %c0_11 = arith.constant 0 : index
    %c0_12 = arith.constant 0 : index
    %17 = vector.load %arg6[%c0_11, %c0_12] : memref<32x4xf32, #tpu.memory_space<vmem>>, vector<32x4xf32>
    tpu.vector_store %arg6[%c0_11, %c0_12], %16 {strides = array<i32>} : memref<32x4xf32, #tpu.memory_space<vmem>>, vector<32x4xf32>,
    return
  }
  func.func @transform_0(%arg0: i32) -> (i32, i32) {
    %c0_i32 = arith.constant 0 : i32
    %c0_i32_0 = arith.constant 0 : i32
    return %arg0, %c0_i32 : i32, i32
  }
  func.func @transform_1(%arg0: i32) -> (i32, i32) {
    %c0_i32 = arith.constant 0 : i32
    %c0_i32_0 = arith.constant 0 : i32
    %c0_i32_1 = arith.constant 0 : i32
    return %c0_i32, %c0_i32_0 : i32, i32
  }
  func.func @transform_2(%arg0: i32) -> (i32, i32) {
    %c0_i32 = arith.constant 0 : i32
    %c0_i32_0 = arith.constant 0 : i32
    %c0_i32_1 = arith.constant 0 : i32
    return %c0_i32, %c0_i32_0 : i32, i32
  }
  func.func @transform_3(%arg0: i32) -> (i32, i32) {
    %c0_i32 = arith.constant 0 : i32
    %c0_i32_0 = arith.constant 0 : i32
    %c0_i32_1 = arith.constant 0 : i32
    return %c0_i32, %c0_i32_0 : i32, i32
  }
  func.func @transform_4(%arg0: i32) -> (i32, i32) {
    %c0_i32 = arith.constant 0 : i32
    %c0_i32_0 = arith.constant 0 : i32
    %c0_i32_1 = arith.constant 0 : i32
    return %c0_i32, %c0_i32_0 : i32, i32
  }
  func.func @transform_5(%arg0: i32) -> (i32, i32) {
    %c0_i32 = arith.constant 0 : i32
    %c0_i32_0 = arith.constant 0 : i32
    return %arg0, %c0_i32 : i32, i32
  }
}

</mosaic_0001>

<bundles_post_ra>
// kernel: tpu_custom_call.1
= control target key start
LH: loop header
LB: loop body
LE: loop exit
PB: predicated region body
PF: predicated region fallthrough
CT: control target
= control target key end

     0   :  { %10 = vsyncpa [#allocation3], 0  ;;  %s1447_s0 = inlined_call_operand.hbm [shape: f32[50,128], index: 0, kind: input, shape index: {}]   ;;  %s1448_s1 = inlined_call_operand.vmem [shape: f32[128,128], index: 1, kind: input, shape index: {}]   ;;  %s1449_s2 = inlined_call_operand.vmem [shape: f32[1,128], index: 2, kind: input, shape index: {}]   ;;  %s1450_s3 = inlined_call_operand.vmem [shape: f32[128,4], index: 3, kind: input, shape index: {}]   ;;  %s1451_s4 = inlined_call_operand.vmem [shape: f32[1,4], index: 4, kind: input, shape index: {}]   ;;  %s1452_s5 = inlined_call_operand.vmem [shape: f32[50,4], index: 5, kind: output, shape index: {}]  }
   0x1   :  { %12 = vsyncpa [#allocation3 + $0x1], 0  ;;  %s1177_s18 = smov 0   ;;  %s1179_s19 = smov 0  }
   0x2   :  { %s1181_s20 = smov 0   ;;  %s1183_s21 = smov 0  }
   0x3 LB: > { %s1196_s22 = sadd.s32 4294967295, %s1110_s21   ;;  %s1199_s23 = sadd.s32 1, %s1110_s21   ;;  %s1110_s21 = sphi %s1183_s21, %s1461_s21   ;;  %s1106_s20 = sphi %s1181_s20, %s1460_s20   ;;  %s1102_s19 = sphi %s1179_s19, %s1459_s19   ;;  %s1098_s18 = sphi %s1177_s18, %s1458_s18  }
   0x4   : > { %s22_s24 = ssub.s32 %s1110_s21, %s1199_s23  ;;  %s25_s25 = sadd.s32 1, %s1106_s20 }
   0x5   : > { %p23_p0 = scmp.eq.s32.totalorder %s22_s24, 0  ;;  %p32_p1 = scmp.ne.s32.totalorder %s1106_s20, %s1102_s19 }
   0x6   : > { %p33_p2 = scmp.eq.s32.totalorder %s1110_s21, 0  ;;  %p38_p3 = scmp.ne.s32.totalorder %s1102_s19, %s1098_s18 }
   0x7   : > { %s1209_s26 = scalar_select %p23_p0, %s1106_s20, %s25_s25  }
   0x8   : > { %p34_p4 = por %p33_p2, %p32_p1  ;;  %p39_p5 = scmp.eq.s32.totalorder %s1196_s22, 0 }
   0x9   : > { %p146_p6 = scmp.eq.s32.totalorder %s1196_s22, 1  ;;  %p749_p9 = scmp.ge.s32.totalorder %s1110_s21, 2 }
   0xa   : > { %p1213_p7 = por %p39_p5, %p38_p3 }
   0xb   : > { %p1217_p8 = por %p146_p6, %p32_p1  ;;  %180 = sbr.rel (%p749_p9) target bundleno = 48 (0x30), region = 32 }
  0x10   : > { %183 = sbr.rel (!%p34_p4) target bundleno = 48 (0x30), region = 36  ;;  %s184_s29 = sand.u32 (%p34_p4), 1, %s1106_s20  }
  0x11   : > { %s751_s30 = sshll.u32 (%p34_p4), %s1110_s21, 2  ;;  %s750_s6 = sshll.u32 (%p34_p4), %s184_s29, 5 }
  0x12   : > { %s190_s7 = ssub.s32 (%p34_p4), 7, %s751_s30  ;;  %s1227_s10 = scalar_lea.sflag (%p34_p4), [#allocation3], %s184_s29 }
  0x13   : > { %p191_p10 = scmp.lt.s32.totalorder (%p34_p4), %s190_s7, 4  ;;  %s188_s11 = scalar_lea.vmem (%p34_p4), [#allocation2], %s750_s6 }
  0x15   : > { %s1463_s7 = smov (!%p191_p10, %s190_s7), 4 }
  0x16   : > { %s1224_s8 = sshll.u32 %s1463_s7, 7 }
  0x17   : > { %s195_s9 = ssub.s32 512, %s1224_s8 }
  0x18   : > { %196 = vsyncadd %s1227_s10, %s195_s9  ;;  %p753_p11 = scmp.ne.s32.totalorder %s1224_s8, 0  ;;  %s783_s12 = sshll.u32 %s1110_s21, 9 }
  0x19   : > { %s1235_s15 = scalar_lea.hbm %s1447_s0, %s783_s12  ;;  %s201_s16 = sshll.u32 %s188_s11, 4  ;;  %s1237_s16 = int_to_ptr.vmem [resolvable:$true] %s201_s16 }
  0x1a   : > { %s1018_s17 = scalar_lea.hbm %s1235_s15, %s1224_s8  ;;  %s1022_s25 = scalar_lea.hbm %s1447_s0, 896 }
  0x1b   : > { %p1019_p12 = scmp.ne.s32.totalorder %s1235_s15, %s1018_s17  ;;  %p1023_p1 = scmp.lt.s32.totalorder %s1235_s15, %s1447_s0 }
  0x1c   : > { %p1024_p2 = scmp.lt.s32.totalorder %s1022_s25, %s1018_s17 }
  0x1d   : > { %p1020_p13 = pnand %p1019_p12, %p753_p11 }
  0x1e   : > { %p1025_p3 = por %p1024_p2, %p1023_p1 }
  0x1f   : > { %p1021_p0 = pneg %p1020_p13 }
  0x21   : > { %p1026_p4 = pnand %p1025_p3, %p1021_p0 }
  0x23   : > { %1029 = shalt.err (!%p1026_p4)
}
  0x24   : > { %s1030_s6 = scalar_lea.vmem %s1237_s16, %s1224_s8  ;;  %s1144_s7 = smov [#allocation2]  }
  0x25   : > { %p1031_p5 = scmp.ne.s32.totalorder %s1237_s16, %s1030_s6  ;;  %s1034_s9 = sshll.u32 %s1144_s7, 4  ;;  %s1035_s9 = int_to_ptr.vmem [resolvable:$false] %s1034_s9 }
  0x26   : > { %s1036_s11 = scalar_lea.vmem %s1035_s9, 1024  ;;  %p1037_p10 = scmp.lt.s32.totalorder %s1237_s16, %s1035_s9 }
  0x27   : > { %p1032_p6 = pnand %p1031_p5, %p753_p11  ;;  %p1038_p12 = scmp.lt.s32.totalorder %s1036_s11, %s1030_s6 }
  0x29   : > { %p1033_p9 = pneg %p1032_p6  ;;  %p1039_p13 = por %p1038_p12, %p1037_p10 }
  0x2b   : > { %p1040_p1 = pnand %p1039_p13, %p1033_p9 }
  0x2d   : > { %1043 = shalt.err (!%p1040_p1)
}
  0x2e   : > { %s1145_s12 = smov 128   ;;  %s1146_s13 = smov 8  }
  0x2f   : > { %207 = dma.hbm_to_vmem [thread:$0]  (%p753_p11), %s1235_s15, %s1224_s8, %s1237_s16, %s1227_s10, %s1145_s12, %s1145_s12, %s1146_s13  }
  0x30 PF: > { %p757_p0 = scmp.ge.s32.totalorder %s1110_s21, 1  ;;  %p209_p2 = scmp.lt.s32.totalorder %s1110_s21, 3 }
  0x32   : > { %p210_p3 = pnand %p757_p0, %p209_p2 }
  0x33   : > { %s215_s14 = sand.u32 (!%p210_p3), 1, %s1102_s19  }
  0x34   : > { %213 = sbr.rel (%p210_p3) target bundleno = 564 (0x234), region = 40  ;;  %s1266_s17 = sshll.u32 (!%p210_p3), %s215_s14, 5 }
  0x35   : > { %s216_s18 = scalar_lea.sflag (!%p210_p3), [#allocation3], %s215_s14  ;;  %s1269_s24 = scalar_lea.vmem (!%p210_p3), [#allocation2], %s1266_s17 }
  0x39   : > { %1093 = dma.done.wait (%p1213_p7), %s216_s18, 512  }
  0x3a   : > { %1095 = vsyncadd (%p1213_p7), %s216_s18, 4294966784  ;;  %v274_v0 = vld [vmem:[%s1448_s1 + $0x78] sm:$0xff]  ;;  %v273_v1 = vld [vmem:[%s1448_s1 + $0x70] sm:$0xff]  ;;  %vm503_vm0 = vcmask 31744   ;;  %s1382_s14 = scalar_lea.vmem [#allocation4], %s1266_s17   ;;  %s767_s17 = sshll.u32 (%p1217_p8), %s1196_s22, 2 }
  0x3b   : > { %827 = vmatprep.subr.mxu0 %v274_v0  ;;  %v272_v2 = vld [vmem:[%s1448_s1 + $0x68] sm:$0xff]  ;;  %v271_v3 = vld [vmem:[%s1448_s1 + $0x60] sm:$0xff]  ;;  %v270_v5 = vld [vmem:[%s1448_s1 + $0x58] sm:$0xff]  ;;  %s784_s18 = sshll.u32 (%p1217_p8), %s1196_s22, 5  ;;  %s516_s8 = ssub.s32 (%p1217_p8), 7, %s767_s17 }
  0x3c   : > { %828 = vmatpush3.msra.mxu0 %v274_v0  ;;  %v255_v4 = vld [vmem:[%s1269_s24] sm:$0xff]  ;;  %v269_v6 = vld [vmem:[%s1448_s1 + $0x50] sm:$0xff]  ;;  %v268_v7 = vld [vmem:[%s1448_s1 + $0x48] sm:$0xff]  ;;  %s1395_s15 = scalar_lea.vmem (%p1217_p8), %s1452_s5, %s784_s18   ;;  %p517_p7 = scmp.lt.s32.totalorder (%p1217_p8), %s516_s8, 4 }
  0x3d   : > { %829 = vmatprep.subr.mxu0 %v273_v1  ;;  %859 = vmatprep.mubr.f32.mxu0 %v255_v4  ;;  %v267_v8 = vld [vmem:[%s1448_s1 + $0x40] sm:$0xff]  ;;  %v266_v9 = vld [vmem:[%s1448_s1 + $0x38] sm:$0xff]  ;;  %v265_v10 = vld [vmem:[%s1448_s1 + $0x30] sm:$0xff] }
  0x3e   : > { %830 = vmatpush3.msra.mxu0 %v273_v1  ;;  %v264_v11 = vld [vmem:[%s1448_s1 + $0x28] sm:$0xff]  ;;  %v263_v12 = vld [vmem:[%s1448_s1 + $0x20] sm:$0xff]  ;;  %v262_v13 = vld [vmem:[%s1448_s1 + $0x18] sm:$0xff] }
  0x3f   : > { %831 = vmatprep.subr.mxu0 %v272_v2  ;;  %v261_v14 = vld [vmem:[%s1448_s1 + $0x10] sm:$0xff]  ;;  %v260_v15 = vld [vmem:[%s1448_s1 + $0x8] sm:$0xff]  ;;  %v259_v16 = vld [vmem:[%s1448_s1] sm:$0xff] }
  0x40   : > { %832 = vmatpush3.msra.mxu0 %v272_v2  ;;  %v256_v17 = vld [vmem:[%s1269_s24 + $0x8] sm:$0xff]  ;;  %v257_v18 = vld [vmem:[%s1269_s24 + $0x10] sm:$0xff]  ;;  %v258_v19 = vld [vmem:[%s1269_s24 + $0x18] sm:$0xff] }
  0x41   : > { %833 = vmatprep.subr.mxu0 %v271_v3  ;;  %v410_v20 = vld [vmem:[%s1450_s3 + $0x78] sm:$0xff]  ;;  %v409_v21 = vld [vmem:[%s1450_s3 + $0x70] sm:$0xff]  ;;  %v408_v22 = vld [vmem:[%s1450_s3 + $0x68] sm:$0xff] }
  0x42   : > { %834 = vmatpush3.msra.mxu0 %v271_v3  ;;  %865 = vmatprep.subr.mxu1 %v410_v20  ;;  %v407_v23 = vld [vmem:[%s1450_s3 + $0x60] sm:$0xff]  ;;  %v406_v24 = vld [vmem:[%s1450_s3 + $0x58] sm:$0xff]  ;;  %v405_v25 = vld [vmem:[%s1450_s3 + $0x50] sm:$0xff] }
  0x43   : > { %835 = vmatprep.subr.mxu0 %v270_v5  ;;  %866 = vmatpush3.msra.mxu1 %v410_v20  ;;  %v404_v26 = vld [vmem:[%s1450_s3 + $0x48] sm:$0xff]  ;;  %v403_v27 = vld [vmem:[%s1450_s3 + $0x40] sm:$0xff]  ;;  %v402_v28 = vld [vmem:[%s1450_s3 + $0x38] sm:$0xff] }
  0x44   : > { %836 = vmatpush3.msra.mxu0 %v270_v5  ;;  %867 = vmatprep.subr.mxu1 %v409_v21  ;;  %v401_v29 = vld [vmem:[%s1450_s3 + $0x30] sm:$0xff]  ;;  %v400_v30 = vld [vmem:[%s1450_s3 + $0x28] sm:$0xff]  ;;  %v399_v31 = vld [vmem:[%s1450_s3 + $0x20] sm:$0xff] }
  0x45   : > { %837 = vmatprep.subr.mxu0 %v269_v6  ;;  %868 = vmatpush3.msra.mxu1 %v409_v21  ;;  %v398_v32 = vld [vmem:[%s1450_s3 + $0x18] sm:$0xff]  ;;  %v397_v33 = vld [vmem:[%s1450_s3 + $0x10] sm:$0xff]  ;;  %v396_v34 = vld [vmem:[%s1450_s3 + $0x8] sm:$0xff] }
  0x46   : > { %838 = vmatpush3.msra.mxu0 %v269_v6  ;;  %869 = vmatprep.subr.mxu1 %v408_v22  ;;  %v395_v35 = vld [vmem:[%s1450_s3] sm:$0xff] }
  0x47   : > { %839 = vmatprep.subr.mxu0 %v268_v7  ;;  %870 = vmatpush3.msra.mxu1 %v408_v22  ;;  %v760_v36 = vld [vmem:[%s1449_s2] ss:$0 sm:$0xff] }
  0x48   : > { %840 = vmatpush3.msra.mxu0 %v268_v7  ;;  %871 = vmatprep.subr.mxu1 %v407_v23  ;;  %v765_v1 = vld [vmem:[%s1451_s4] ss:$0 sm:$0xff] }
  0x49   : > { %841 = vmatprep.subr.mxu0 %v267_v8  ;;  %872 = vmatpush3.msra.mxu1 %v407_v23 }
  0x4a   : > { %842 = vmatpush3.msra.mxu0 %v267_v8  ;;  %873 = vmatprep.subr.mxu1 %v406_v24 }
  0x4b   : > { %843 = vmatprep.subr.mxu0 %v266_v9  ;;  %874 = vmatpush3.msra.mxu1 %v406_v24 }
  0x4c   : > { %844 = vmatpush3.msra.mxu0 %v266_v9  ;;  %875 = vmatprep.subr.mxu1 %v405_v25 }
  0x4d   : > { %845 = vmatprep.subr.mxu0 %v265_v10  ;;  %876 = vmatpush3.msra.mxu1 %v405_v25 }
  0x4e   : > { %846 = vmatpush3.msra.mxu0 %v265_v10  ;;  %877 = vmatprep.subr.mxu1 %v404_v26 }
  0x4f   : > { %847 = vmatprep.subr.mxu0 %v264_v11  ;;  %878 = vmatpush3.msra.mxu1 %v404_v26 }
  0x50   : > { %848 = vmatpush3.msra.mxu0 %v264_v11  ;;  %879 = vmatprep.subr.mxu1 %v403_v27 }
  0x51   : > { %849 = vmatprep.subr.mxu0 %v263_v12  ;;  %880 = vmatpush3.msra.mxu1 %v403_v27 }
  0x52   : > { %850 = vmatpush3.msra.mxu0 %v263_v12  ;;  %881 = vmatprep.subr.mxu1 %v402_v28 }
  0x53   : > { %851 = vmatprep.subr.mxu0 %v262_v13  ;;  %882 = vmatpush3.msra.mxu1 %v402_v28 }
  0x54   : > { %852 = vmatpush3.msra.mxu0 %v262_v13  ;;  %883 = vmatprep.subr.mxu1 %v401_v29 }
  0x55   : > { %853 = vmatprep.subr.mxu0 %v261_v14  ;;  %884 = vmatpush3.msra.mxu1 %v401_v29 }
  0x56   : > { %854 = vmatpush3.msra.mxu0 %v261_v14  ;;  %885 = vmatprep.subr.mxu1 %v400_v30 }
  0x57   : > { %855 = vmatprep.subr.mxu0 %v260_v15  ;;  %886 = vmatpush3.msra.mxu1 %v400_v30 }
  0x58   : > { %856 = vmatpush3.msra.mxu0 %v260_v15  ;;  %887 = vmatprep.subr.mxu1 %v399_v31 }
  0x59   : > { %857 = vmatprep.subr.mxu0 %v259_v16  ;;  %888 = vmatpush3.msra.mxu1 %v399_v31 }
  0x5a   : > { %858 = vmatpush3.msra.mxu0 %v259_v16  ;;  %889 = vmatprep.subr.mxu1 %v398_v32 }
  0x5b   : > { %860 = vmatmul.mubr.f32.vlgmr.msra.gmra.mxu0 %v256_v17  ;;  %890 = vmatpush3.msra.mxu1 %v398_v32 }
  0x5c   : > { %862 = vmatprep.mubr.f32.mxu0 %v257_v18  ;;  %891 = vmatprep.subr.mxu1 %v397_v33 }
  0x5d   : > { %892 = vmatpush3.msra.mxu1 %v397_v33 }
  0x5e   : > { %893 = vmatprep.subr.mxu1 %v396_v34 }
  0x5f   : > { %863 = vmatmul.mubr.f32.gmra.mxu0 %v258_v19  ;;  %894 = vmatpush3.msra.mxu1 %v396_v34 }
  0x60   : > { %895 = vmatprep.subr.mxu1 %v395_v35 }
  0x61   : > { %896 = vmatpush3.msra.mxu1 %v395_v35 }
 0x11b   : > { %v861_v37 = vpop.f32.mrf.mxu0 }
 0x11c   : > { %v354_v38 = vadd.f32 %v861_v37, %v760_v36 }
 0x11d   : > { %v348_v39 = vpop.f32.mrf.mxu0 }
 0x11e   : > { %v762_v40 = vmul.f32 -1.442695, %v354_v38  ;;  %v349_v41 = vadd.f32 %v760_v36, %v348_v39 }
 0x11f   : > { %v864_v42 = vpop.f32.mrf.mxu0 }
 0x120   : > { %1002 = vpow2.f32 %v762_v40  ;;  %v761_v43 = vmul.f32 -1.442695, %v349_v41  ;;  %v364_v44 = vadd.f32 %v864_v42, %v760_v36 }
 0x121   : > { %v358_v45 = vpop.f32.mrf.mxu0 }
 0x122   : > { %1004 = vpow2.f32 %v761_v43  ;;  %v764_v46 = vmul.f32 -1.442695, %v364_v44  ;;  %v359_v47 = vadd.f32 %v760_v36, %v358_v45 }
 0x124   : > { %1006 = vpow2.f32 %v764_v46  ;;  %v763_v48 = vmul.f32 -1.442695, %v359_v47 }
 0x126   : > { %1008 = vpow2.f32 %v763_v48 }
 0x12d   : > { %v1003_v49 = vpop.eup %1002 }
 0x12e   : > { %v380_v50 = vadd.f32 1.0, %v1003_v49 }
 0x12f   : > { %v1005_v51 = vpop.eup %1004 }
 0x130   : > { %v379_v52 = vadd.f32 1.0, %v1005_v51  ;;  %1010 = vrcp.f32 %v380_v50 }
 0x131   : > { %v1007_v53 = vpop.eup %1006 }
 0x132   : > { %1012 = vrcp.f32 %v379_v52  ;;  %v382_v54 = vadd.f32 1.0, %v1007_v53 }
 0x133   : > { %v1009_v55 = vpop.eup %1008 }
 0x134   : > { %v381_v56 = vadd.f32 1.0, %v1009_v55  ;;  %1014 = vrcp.f32 %v382_v54 }
 0x136   : > { %1016 = vrcp.f32 %v381_v56 }
 0x13d   : > { %v1011_v57 = vpop.eup %1010 }
 0x13e   : > { %v392_v60 = vmul.f32 %v1011_v57, %v354_v38 }
 0x13f   : > { %v1013_v58 = vpop.eup %1012 }
 0x140   : > { %v391_v59 = vmul.f32 %v1013_v58, %v349_v41 }
 0x141   : > { %v1015_v61 = vpop.eup %1014 }
 0x142   : > { %897 = vmatprep.mubr.f32.mxu1 %v391_v59  ;;  %v394_v0 = vmul.f32 %v1015_v61, %v364_v44 }
 0x143   : > { %v1017_v62 = vpop.eup %1016  ;;  %898 = vmatmul.mubr.f32.vlgmr.msra.gmra.mxu1 %v392_v60 }
 0x144   : > { %v393_v63 = vmul.f32 %v1017_v62, %v359_v47 }
 0x146   : > { %900 = vmatprep.mubr.f32.mxu1 %v393_v63 }
 0x147   : > { %901 = vmatmul.mubr.f32.gmra.mxu1 %v394_v0 }
 0x203   : > { %v899_v2 = vpop.f32.mrf.mxu1 }
 0x204   : > { %v490_v3 = vadd.f32 %v899_v2, %v765_v1 }
 0x205   : > { %v484_v4 = vpop.f32.mrf.mxu1 }
 0x206   : > { %505 = vst.msk [vmem:[%s1382_s14 + $0x8] sm:$0xff] %vm503_vm0, %v490_v3  ;;  %v485_v5 = vadd.f32 %v765_v1, %v484_v4 }
 0x207   : > { %v902_v6 = vpop.f32.mrf.mxu1 }
 0x208   : > { %504 = vst.msk [vmem:[%s1382_s14] sm:$0xff] %vm503_vm0, %v485_v5  ;;  %v500_v7 = vadd.f32 %v902_v6, %v765_v1  ;;  %514 = sbr.rel (!%p1217_p8) target bundleno = 564 (0x234), region = 48 }
 0x209   : > { %v494_v8 = vpop.f32.mrf.mxu1 }
 0x20a   : > { %507 = vst.msk [vmem:[%s1382_s14 + $0x18] sm:$0xff] %vm503_vm0, %v500_v7  ;;  %v495_v9 = vadd.f32 %v765_v1, %v494_v8 }
 0x20c   : > { %506 = vst.msk [vmem:[%s1382_s14 + $0x10] sm:$0xff] %vm503_vm0, %v495_v9 }
 0x20d   : > { %s1465_s8 = smov (!%p517_p7, %s516_s8), 4 }
 0x20e   : > { %s768_s24 = sshll.u32 %s1465_s8, 7 }
 0x20f   : > { %p771_p11 = scmp.eq.s32.totalorder %s768_s24, 0 }
 0x210   : > { %s1401_s28 = sshrl.u32 (!%p771_p11), %s1465_s8, 2 }
 0x211   : > { %525 = sbr.rel (%p771_p11) target bundleno = 564 (0x234), region = 52  ;;  %p772_p8 = scmp.le.s32.totalorder (!%p771_p11), %s1401_s28, 0 }
 0x216   : > { %700 = sbr.rel (%p772_p8) target bundleno = 547 (0x223), region = 134  ;;  %s1455_s22 = smov (!%p772_p8), %s1395_s15 }
 0x217   : > { %s1456_s16 = smov (!%p772_p8), %s1382_s14  ;;  %s1410_s25 = smov (!%p772_p8), 0  }
 0x218   : > { %s1124_s29 = smov (!%p772_p8), 0  }
 0x21b LB: >> { %v594_v10 = vld [vmem:[%s1118_s16] sm:$0xff]  ;;  %v596_v11 = vld [vmem:[%s1118_s16 + $0x8] sm:$0xff]  ;;  %v598_v12 = vld [vmem:[%s1118_s16 + $0x10] sm:$0xff]  ;;  %s602_s27 = sadd.s32 1, %s1122_s25  ;;  %s588_s29 = sadd.s32 1, %s1126_s29   ;;  %s1126_s29 = sphi %s1124_s29, %s588_s29   ;;  %s1122_s25 = sphi %s1410_s25, %s1457_s25   ;;  %s1118_s16 = sphi %s1456_s16, %s607_s16   ;;  %s1114_s22 = sphi %s1455_s22, %s608_s22  }
 0x21c   : >> { %595 = vst [vmem:[%s1114_s22] sm:$0xff] %v594_v10  ;;  %597 = vst [vmem:[%s1114_s22 + $0x8] sm:$0xff] %v596_v11  ;;  %v600_v13 = vld [vmem:[%s1118_s16 + $0x18] sm:$0xff]  ;;  %p603_p4 = scmp.ge.s32.totalorder %s602_s27, %s1401_s28  ;;  %p587_p5 = scmp.ge.s32.totalorder %s588_s29, %s1401_s28 }
 0x21d   : >> { %599 = vst [vmem:[%s1114_s22 + $0x10] sm:$0xff] %v598_v12  ;;  %601 = vst [vmem:[%s1114_s22 + $0x18] sm:$0xff] %v600_v13 }
 0x21e   : >> { %s1467_s27 = smov (%p603_p4, %s602_s27), 0  ;;  %590 = sbr.rel (!%p587_p5) target bundleno = 539 (0x21b), region = 140 }
 0x21f   : >> { %s773_s30 = sshll.u32 %s1467_s27, 5  ;;  %s1457_s25 = smov %s1467_s27 }
 0x220   : >> { %s607_s16 = scalar_lea.vmem %s1382_s14, %s773_s30 [#allocation4]   ;;  %s608_s22 = scalar_lea.vmem %s1395_s15, %s773_s30  }
 0x223 PF: > { %s1426_s6 = sand.u32 3, %s1465_s8   ;;  %s785_s7 = sshll.u32 %s1401_s28, 5 }
 0x224   : > { %s613_s9 = scalar_lea.vmem %s1382_s14, %s785_s7 [#allocation4]   ;;  %s615_s11 = scalar_lea.vmem %s1395_s15, %s785_s7  }
 0x225   : > { %p778_p6 = scmp.le.s32.totalorder %s1426_s6, 0 }
 0x226   : > { %s1128_s12 = smov (!%p778_p6), %s615_s11   ;;  %s1132_s13 = smov (!%p778_p6), %s613_s9  }
 0x227   : > { %714 = sbr.rel (%p778_p6) target bundleno = 564 (0x234), region = 145  ;;  %s1136_s17 = smov (!%p778_p6), 0  }
 0x228   : > { %s1140_s18 = smov (!%p778_p6), 0  }
 0x22c LB: >> { %v625_v14 = vld [vmem:[%s1134_s13] sm:$0xff]  ;;  %s627_s8 = sadd.s32 1, %s1138_s17  ;;  %s619_s18 = sadd.s32 1, %s1142_s18   ;;  %s1142_s18 = sphi %s1140_s18, %s619_s18   ;;  %s1138_s17 = sphi %s1136_s17, %s1137_s17   ;;  %s1134_s13 = sphi %s1132_s13, %s632_s13   ;;  %s1130_s12 = sphi %s1128_s12, %s633_s12  }
 0x22d   : >> { %626 = vst [vmem:[%s1130_s12] sm:$0xff] %v625_v14  ;;  %p628_p9 = scmp.ge.s32.totalorder %s627_s8, %s1426_s6  ;;  %p618_p10 = scmp.ge.s32.totalorder %s619_s18, %s1426_s6 }
 0x22f   : >> { %s1469_s8 = smov (%p628_p9, %s627_s8), 0  ;;  %621 = sbr.rel (!%p618_p10) target bundleno = 556 (0x22c), region = 151 }
 0x230   : >> { %s779_s14 = sshll.u32 %s1469_s8, 3  ;;  %s1137_s17 = smov %s1469_s8  }
 0x231   : >> { %s632_s13 = scalar_lea.vmem %s613_s9, %s779_s14 [#allocation4]   ;;  %s633_s12 = scalar_lea.vmem %s615_s11, %s779_s14  }
 0x234 PF: > { %p15_p12 = scmp.ge.s32.totalorder %s1199_s23, 4   ;;  %s1458_s18 = smov %s1102_s19 }
 0x235   : > { %s1459_s19 = smov %s1106_s20  ;;  %s1460_s20 = smov %s1209_s26 }
 0x236   : > { %s1461_s21 = smov %s1199_s23  ;;  %17 = sbr.rel (!%p15_p12) target bundleno = 3 (0x3), region = 162 }
 0x23b   :  { %649 = vsyncpa [#allocation3], 1 }
 0x23c   :  { %651 = vsyncpa [#allocation3 + $0x1], 1 }

</bundles_post_ra>
